<compile_context>
chip_gen: v6e
topology: v6e:2x2x1
jax: 0.10.0
libtpu: 0.0.40
codegen_flags: <defaults>
</compile_context>

<pallas_src>
import jax
import jax.numpy as jnp
from jax.experimental import pallas as pl
from jax.experimental.pallas import tpu as pltpu


def _round_up(x, m):
    return ((x + m - 1) // m) * m


def _sublane_multiple(dtype):
    itemsize = jnp.dtype(dtype).itemsize
    return {4: 8, 2: 16, 1: 32}.get(itemsize, 8)


def center_loss_kernel(feat_ref, center_ref, tgt_ref, scale_ref, cnorm_ref,
                       out_ref):
    # feat_ref:   (TB, Fp)   feature tile
    # center_ref: (Cp, Fp)   all class centers (VMEM resident across tiles)
    # tgt_ref:    (TB, 1)    int32 class id per row
    # scale_ref:  (TB, 1)    1/(2*count) per row (0 for padded rows)
    # cnorm_ref:  (TB, 1)    ||center[target]||^2 per row (0 for padded rows)
    # out_ref:    (1, 128)   per-tile partial loss in lane 0
    feat = feat_ref[...].astype(jnp.float32)                       # (TB, Fp)

    # F.normalize: x / max(||x||, 1e-12) == x * rsqrt(max(||x||^2, 1e-24))
    sumsq = jnp.sum(feat * feat, axis=1, keepdims=True)            # (TB, 1)
    inv = jax.lax.rsqrt(jnp.maximum(sumsq, 1e-24))
    feat_n = feat * inv
    fn_sq = sumsq * inv * inv          # == ||feat_n||^2 (1 real rows, 0 padded)

    # One MXU matmul instead of a serial per-row gather: S[r,c] = f_n[r].c[c]
    cen = center_ref[...].astype(jnp.float32)                      # (Cp, Fp)
    s = jax.lax.dot_general(feat_n, cen, (((1,), (1,)), ((), ())),
                            preferred_element_type=jnp.float32)    # (TB, Cp)

    # Pick column target[r] per row via masked lane reduction.
    col = jax.lax.broadcasted_iota(jnp.int32, s.shape, dimension=1)
    cross = jnp.sum(jnp.where(col == tgt_ref[...], s, 0.0),
                    axis=1, keepdims=True)                         # (TB, 1)

    # ||f_n - c_t||^2 = ||f_n||^2 + ||c_t||^2 - 2 f_n.c_t
    row = fn_sq + cnorm_ref[...] - 2.0 * cross                     # (TB, 1)
    partial = jnp.sum(row * scale_ref[...])

    lane = jax.lax.broadcasted_iota(jnp.int32, (1, 128), 1)
    out_ref[...] = jnp.where(lane == 0, partial, 0.0)


def center_loss(feature, center, target, *, tile_b=512):
    B, Fdim = feature.shape
    C, _ = center.shape
    target = target.astype(jnp.int32)

    # Loop-invariant precompute (done once, outside the kernel):
    #   histogram -> per-sample scale = 1/(2*count), and ||center[target]||^2.
    counter = jnp.zeros((C,), jnp.float32).at[target].add(1.0)     # == histc
    scale = (0.5 / counter[target]).astype(jnp.float32).reshape(B, 1)
    cnorm = jnp.sum(center.astype(jnp.float32) ** 2, axis=1)       # (C,)
    cnorm_t = cnorm[target].reshape(B, 1)

    # Lane-dense padding for feature and class dims; dtype-aware sublane tile.
    Fp = _round_up(Fdim, 128)
    Cp = _round_up(C, 128)
    sub = _sublane_multiple(feature.dtype)
    TB = _round_up(min(tile_b, _round_up(B, sub)), sub)
    Bp = _round_up(B, TB)
    num_tiles = Bp // TB

    feat_p = jnp.zeros((Bp, Fp), feature.dtype).at[:B, :Fdim].set(feature)
    cent_p = jnp.zeros((Cp, Fp), center.dtype).at[:C, :Fdim].set(center)
    tgt_p = jnp.zeros((Bp, 1), jnp.int32).at[:B, 0].set(target)
    scale_p = jnp.zeros((Bp, 1), jnp.float32).at[:B].set(scale)    # pads -> 0
    cnorm_p = jnp.zeros((Bp, 1), jnp.float32).at[:B].set(cnorm_t)  # pads -> 0

    def build(single_buffer_center):
        center_kwargs = {}
        if single_buffer_center:
            # Constant index_map -> fetched once; single buffer halves its VMEM.
            center_kwargs = dict(pipeline_mode=pl.Buffered(1))
        in_specs = [
            pl.BlockSpec((TB, Fp), lambda i: (i, 0)),              # feature tile
            pl.BlockSpec((Cp, Fp), lambda i: (0, 0), **center_kwargs),  # centers
            pl.BlockSpec((TB, 1), lambda i: (i, 0)),               # targets
            pl.BlockSpec((TB, 1), lambda i: (i, 0)),               # scale
            pl.BlockSpec((TB, 1), lambda i: (i, 0)),               # ||c_t||^2
        ]
        return pl.pallas_call(
            center_loss_kernel,
            out_shape=jax.ShapeDtypeStruct((1, 128 * num_tiles), jnp.float32),
            grid=(num_tiles,),
            in_specs=in_specs,
            out_specs=pl.BlockSpec((1, 128), lambda i: (0, i)),    # per-tile partial
            compiler_params=pltpu.CompilerParams(
                dimension_semantics=("parallel",),
                vmem_limit_bytes=48 * 1024 * 1024,
            ),
        )

    try:
        partials = build(True)(feat_p, cent_p, tgt_p, scale_p, cnorm_p)
    except Exception:
        # Fallback if this JAX build rejects single-buffered pipeline_mode.
        partials = build(False)(feat_p, cent_p, tgt_p, scale_p, cnorm_p)

    return jnp.sum(partials)


def _center_loss_ref(feature, center, target):
    # Pure-JAX reference matching the PyTorch module.
    f = feature.astype(jnp.float32)
    sumsq = jnp.sum(f * f, axis=1, keepdims=True)
    f_n = f * jax.lax.rsqrt(jnp.maximum(sumsq, 1e-24))
    centre = center.astype(jnp.float32)[target]
    counter = jnp.zeros((center.shape[0],), jnp.float32).at[target].add(1.0)
    count = counter[target]
    dist = jnp.sum((f_n - centre) ** 2, axis=1) / count
    return jnp.sum(dist) / 2.0


if __name__ == "__main__":
    # Small deterministic example: cls_num=4, feature_num=32, batch=8
    cls_num, feature_num, batch = 4, 32, 8

    key = jax.random.PRNGKey(0)
    k_feat, k_center, k_target = jax.random.split(key, 3)

    feature = jax.random.normal(k_feat, (batch, feature_num), dtype=jnp.float32)
    # nn.Parameter(torch.randn(cls_num, feature_num)) — deterministic synthetic init
    center = jax.random.normal(k_center, (cls_num, feature_num), dtype=jnp.float32)
    target = jax.random.randint(k_target, (batch,), 0, cls_num, dtype=jnp.int32)

    loss = center_loss(feature, center, target)
    jax.block_until_ready(loss)

    ref = _center_loss_ref(feature, center, target)
    assert jnp.allclose(loss, ref, rtol=1e-3, atol=1e-3), (loss, ref)
    print("KERNEL_OK")
</pallas_src>

<mosaic_0001>
module attributes {stable_mosaic.version = 11 : i64} {
  func.func @center_loss_kernel(%arg0: i32, %arg1: memref<8x128xf32, #tpu.memory_space<vmem>>, %arg2: memref<128x128xf32, #tpu.memory_space<vmem>>, %arg3: memref<8x1xi32, #tpu.memory_space<vmem>>, %arg4: memref<8x1xf32, #tpu.memory_space<vmem>>, %arg5: memref<8x1xf32, #tpu.memory_space<vmem>>, %arg6: memref<1x128xf32, #tpu.memory_space<vmem>>) attributes {dimension_semantics = [#tpu.dimension_semantics<parallel>], iteration_bounds = array<i64: 1>, scalar_prefetch = 0 : i64, scratch_operands = 0 : i64, tpu.core_type = #tpu.core_type<tc>, window_params = [{transform_indices = @transform_0, window_bounds = array<i64: 8, 128>}, {pipeline_mode = #tpu.pipeline_mode<synchronous>, transform_indices = @transform_1, window_bounds = array<i64: 128, 128>}, {transform_indices = @transform_2, window_bounds = array<i64: 8, 1>}, {transform_indices = @transform_3, window_bounds = array<i64: 8, 1>}, {transform_indices = @transform_4, window_bounds = array<i64: 8, 1>}, {transform_indices = @transform_5, window_bounds = array<i64: 1, 128>}]} {
    %c0 = arith.constant 0 : index
    %c0_0 = arith.constant 0 : index
    %0 = vector.load %arg1[%c0, %c0_0] : memref<8x128xf32, #tpu.memory_space<vmem>>, vector<8x128xf32>
    %1 = arith.mulf %0, %0 : vector<8x128xf32>
    %cst = arith.constant dense<0.000000e+00> : vector<8xf32>
    %2 = vector.multi_reduction <add>, %1, %cst [1] : vector<8x128xf32> to vector<8xf32>
    %3 = vector.shape_cast %2 : vector<8xf32> to vector<8x1xf32>
    %cst_1 = arith.constant 1.000000e-24 : f32
    %4 = vector.broadcast %cst_1 : f32 to vector<8x1xf32>
    %5 = arith.maximumf %3, %4 : vector<8x1xf32>
    %6 = math.rsqrt %5 : vector<8x1xf32>
    %7 = vector.broadcast %6 : vector<8x1xf32> to vector<8x128xf32>
    %8 = arith.mulf %0, %7 : vector<8x128xf32>
    %9 = arith.mulf %3, %6 : vector<8x1xf32>
    %10 = arith.mulf %9, %6 : vector<8x1xf32>
    %c0_2 = arith.constant 0 : index
    %c0_3 = arith.constant 0 : index
    %11 = vector.load %arg2[%c0_2, %c0_3] : memref<128x128xf32, #tpu.memory_space<vmem>>, vector<128x128xf32>
    %cst_4 = arith.constant dense<0.000000e+00> : vector<8x128xf32>
    %12 = tpu.matmul %8, %11, %cst_4 {dimension_numbers = #tpu.dot_dimension_numbers<[1], [1], [0], [0], [0, 0, 1, 0], [], []>} : vector<8x128xf32>, vector<128x128xf32>, vector<8x128xf32> -> vector<8x128xf32>
    %13 = tpu.iota {dimensions = array<i32: 1>} : vector<8x128xi32>
    %c0_5 = arith.constant 0 : index
    %c0_6 = arith.constant 0 : index
    %14 = vector.load %arg3[%c0_5, %c0_6] : memref<8x1xi32, #tpu.memory_space<vmem>>, vector<8x1xi32>
    %15 = vector.broadcast %14 : vector<8x1xi32> to vector<8x128xi32>
    %16 = arith.cmpi eq, %13, %15 : vector<8x128xi32>
    %cst_7 = arith.constant 0.000000e+00 : f32
    %17 = vector.broadcast %cst_7 : f32 to vector<8x128xf32>
    %18 = arith.select %16, %12, %17 : vector<8x128xi1>, vector<8x128xf32>
    %cst_8 = arith.constant dense<0.000000e+00> : vector<8xf32>
    %19 = vector.multi_reduction <add>, %18, %cst_8 [1] : vector<8x128xf32> to vector<8xf32>
    %20 = vector.shape_cast %19 : vector<8xf32> to vector<8x1xf32>
    %c0_9 = arith.constant 0 : index
    %c0_10 = arith.constant 0 : index
    %21 = vector.load %arg5[%c0_9, %c0_10] : memref<8x1xf32, #tpu.memory_space<vmem>>, vector<8x1xf32>
    %22 = arith.addf %10, %21 : vector<8x1xf32>
    %cst_11 = arith.constant 2.000000e+00 : f32
    %23 = vector.broadcast %cst_11 : f32 to vector<8x1xf32>
    %24 = arith.mulf %23, %20 : vector<8x1xf32>
    %25 = arith.subf %22, %24 : vector<8x1xf32>
    %c0_12 = arith.constant 0 : index
    %c0_13 = arith.constant 0 : index
    %26 = vector.load %arg4[%c0_12, %c0_13] : memref<8x1xf32, #tpu.memory_space<vmem>>, vector<8x1xf32>
    %27 = arith.mulf %25, %26 : vector<8x1xf32>
    %28 = vector.shape_cast %27 : vector<8x1xf32> to vector<1x8x1xf32>
    %cst_14 = arith.constant dense<0.000000e+00> : vector<1xf32>
    %29 = vector.multi_reduction <add>, %28, %cst_14 [1, 2] : vector<1x8x1xf32> to vector<1xf32>
    %30 = vector.shape_cast %29 : vector<1xf32> to vector<1x1x1xf32>
    %31 = vector.extract %30[0, 0, 0] : f32 from vector<1x1x1xf32>
    %32 = tpu.iota {dimensions = array<i32: 1>} : vector<1x128xi32>
    %c0_i32 = arith.constant 0 : i32
    %33 = vector.broadcast %c0_i32 : i32 to vector<1x128xi32>
    %34 = arith.cmpi eq, %32, %33 : vector<1x128xi32>
    %cst_15 = arith.constant 0.000000e+00 : f32
    %35 = vector.broadcast %31 : f32 to vector<1x128xf32>
    %36 = vector.broadcast %cst_15 : f32 to vector<1x128xf32>
    %37 = arith.select %34, %35, %36 : vector<1x128xi1>, vector<1x128xf32>
    %c0_16 = arith.constant 0 : index
    %c0_17 = arith.constant 0 : index
    %38 = vector.load %arg6[%c0_16, %c0_17] : memref<1x128xf32, #tpu.memory_space<vmem>>, vector<1x128xf32>
    tpu.vector_store %arg6[%c0_16, %c0_17], %37 {strides = array<i32>} : memref<1x128xf32, #tpu.memory_space<vmem>>, vector<1x128xf32>,
    return
  }
  func.func @transform_0(%arg0: i32) -> (i32, i32) {
    %c0_i32 = arith.constant 0 : i32
    %c0_i32_0 = arith.constant 0 : i32
    return %arg0, %c0_i32 : i32, i32
  }
  func.func @transform_1(%arg0: i32) -> (i32, i32) {
    %c0_i32 = arith.constant 0 : i32
    %c0_i32_0 = arith.constant 0 : i32
    %c0_i32_1 = arith.constant 0 : i32
    return %c0_i32, %c0_i32_0 : i32, i32
  }
  func.func @transform_2(%arg0: i32) -> (i32, i32) {
    %c0_i32 = arith.constant 0 : i32
    %c0_i32_0 = arith.constant 0 : i32
    return %arg0, %c0_i32 : i32, i32
  }
  func.func @transform_3(%arg0: i32) -> (i32, i32) {
    %c0_i32 = arith.constant 0 : i32
    %c0_i32_0 = arith.constant 0 : i32
    return %arg0, %c0_i32 : i32, i32
  }
  func.func @transform_4(%arg0: i32) -> (i32, i32) {
    %c0_i32 = arith.constant 0 : i32
    %c0_i32_0 = arith.constant 0 : i32
    return %arg0, %c0_i32 : i32, i32
  }
  func.func @transform_5(%arg0: i32) -> (i32, i32) {
    %c0_i32 = arith.constant 0 : i32
    %c0_i32_0 = arith.constant 0 : i32
    return %c0_i32, %arg0 : i32, i32
  }
}

module attributes {stable_mosaic.version = 11 : i64} {
  func.func @center_loss_kernel(%arg0: i32, %arg1: memref<8x128xf32, #tpu.memory_space<vmem>>, %arg2: memref<128x128xf32, #tpu.memory_space<vmem>>, %arg3: memref<8x1xi32, #tpu.memory_space<vmem>>, %arg4: memref<8x1xf32, #tpu.memory_space<vmem>>, %arg5: memref<8x1xf32, #tpu.memory_space<vmem>>, %arg6: memref<1x128xf32, #tpu.memory_space<vmem>>) attributes {dimension_semantics = [#tpu.dimension_semantics<parallel>], iteration_bounds = array<i64: 1>, scalar_prefetch = 0 : i64, scratch_operands = 0 : i64, tpu.core_type = #tpu.core_type<tc>, window_params = [{transform_indices = @transform_0, window_bounds = array<i64: 8, 128>}, {pipeline_mode = #tpu.pipeline_mode<synchronous>, transform_indices = @transform_1, window_bounds = array<i64: 128, 128>}, {transform_indices = @transform_2, window_bounds = array<i64: 8, 1>}, {transform_indices = @transform_3, window_bounds = array<i64: 8, 1>}, {transform_indices = @transform_4, window_bounds = array<i64: 8, 1>}, {transform_indices = @transform_5, window_bounds = array<i64: 1, 128>}]} {
    %c0 = arith.constant 0 : index
    %c0_0 = arith.constant 0 : index
    %0 = vector.load %arg1[%c0, %c0_0] : memref<8x128xf32, #tpu.memory_space<vmem>>, vector<8x128xf32>
    %1 = arith.mulf %0, %0 : vector<8x128xf32>
    %cst = arith.constant dense<0.000000e+00> : vector<8xf32>
    %2 = vector.multi_reduction <add>, %1, %cst [1] : vector<8x128xf32> to vector<8xf32>
    %3 = vector.shape_cast %2 : vector<8xf32> to vector<8x1xf32>
    %cst_1 = arith.constant 1.000000e-24 : f32
    %4 = vector.broadcast %cst_1 : f32 to vector<8x1xf32>
    %5 = arith.maximumf %3, %4 : vector<8x1xf32>
    %6 = math.rsqrt %5 : vector<8x1xf32>
    %7 = vector.broadcast %6 : vector<8x1xf32> to vector<8x128xf32>
    %8 = arith.mulf %0, %7 : vector<8x128xf32>
    %9 = arith.mulf %3, %6 : vector<8x1xf32>
    %10 = arith.mulf %9, %6 : vector<8x1xf32>
    %c0_2 = arith.constant 0 : index
    %c0_3 = arith.constant 0 : index
    %11 = vector.load %arg2[%c0_2, %c0_3] : memref<128x128xf32, #tpu.memory_space<vmem>>, vector<128x128xf32>
    %cst_4 = arith.constant dense<0.000000e+00> : vector<8x128xf32>
    %12 = tpu.matmul %8, %11, %cst_4 {dimension_numbers = #tpu.dot_dimension_numbers<[1], [1], [0], [0], [0, 0, 1, 0], [], []>} : vector<8x128xf32>, vector<128x128xf32>, vector<8x128xf32> -> vector<8x128xf32>
    %13 = tpu.iota {dimensions = array<i32: 1>} : vector<8x128xi32>
    %c0_5 = arith.constant 0 : index
    %c0_6 = arith.constant 0 : index
    %14 = vector.load %arg3[%c0_5, %c0_6] : memref<8x1xi32, #tpu.memory_space<vmem>>, vector<8x1xi32>
    %15 = vector.broadcast %14 : vector<8x1xi32> to vector<8x128xi32>
    %16 = arith.cmpi eq, %13, %15 : vector<8x128xi32>
    %cst_7 = arith.constant 0.000000e+00 : f32
    %17 = vector.broadcast %cst_7 : f32 to vector<8x128xf32>
    %18 = arith.select %16, %12, %17 : vector<8x128xi1>, vector<8x128xf32>
    %cst_8 = arith.constant dense<0.000000e+00> : vector<8xf32>
    %19 = vector.multi_reduction <add>, %18, %cst_8 [1] : vector<8x128xf32> to vector<8xf32>
    %20 = vector.shape_cast %19 : vector<8xf32> to vector<8x1xf32>
    %c0_9 = arith.constant 0 : index
    %c0_10 = arith.constant 0 : index
    %21 = vector.load %arg5[%c0_9, %c0_10] : memref<8x1xf32, #tpu.memory_space<vmem>>, vector<8x1xf32>
    %22 = arith.addf %10, %21 : vector<8x1xf32>
    %cst_11 = arith.constant 2.000000e+00 : f32
    %23 = vector.broadcast %cst_11 : f32 to vector<8x1xf32>
    %24 = arith.mulf %23, %20 : vector<8x1xf32>
    %25 = arith.subf %22, %24 : vector<8x1xf32>
    %c0_12 = arith.constant 0 : index
    %c0_13 = arith.constant 0 : index
    %26 = vector.load %arg4[%c0_12, %c0_13] : memref<8x1xf32, #tpu.memory_space<vmem>>, vector<8x1xf32>
    %27 = arith.mulf %25, %26 : vector<8x1xf32>
    %28 = vector.shape_cast %27 : vector<8x1xf32> to vector<1x8x1xf32>
    %cst_14 = arith.constant dense<0.000000e+00> : vector<1xf32>
    %29 = vector.multi_reduction <add>, %28, %cst_14 [1, 2] : vector<1x8x1xf32> to vector<1xf32>
    %30 = vector.shape_cast %29 : vector<1xf32> to vector<1x1x1xf32>
    %31 = vector.extract %30[0, 0, 0] : f32 from vector<1x1x1xf32>
    %32 = tpu.iota {dimensions = array<i32: 1>} : vector<1x128xi32>
    %c0_i32 = arith.constant 0 : i32
    %33 = vector.broadcast %c0_i32 : i32 to vector<1x128xi32>
    %34 = arith.cmpi eq, %32, %33 : vector<1x128xi32>
    %cst_15 = arith.constant 0.000000e+00 : f32
    %35 = vector.broadcast %31 : f32 to vector<1x128xf32>
    %36 = vector.broadcast %cst_15 : f32 to vector<1x128xf32>
    %37 = arith.select %34, %35, %36 : vector<1x128xi1>, vector<1x128xf32>
    %c0_16 = arith.constant 0 : index
    %c0_17 = arith.constant 0 : index
    %38 = vector.load %arg6[%c0_16, %c0_17] : memref<1x128xf32, #tpu.memory_space<vmem>>, vector<1x128xf32>
    tpu.vector_store %arg6[%c0_16, %c0_17], %37 {strides = array<i32>} : memref<1x128xf32, #tpu.memory_space<vmem>>, vector<1x128xf32>,
    return
  }
  func.func @transform_0(%arg0: i32) -> (i32, i32) {
    %c0_i32 = arith.constant 0 : i32
    %c0_i32_0 = arith.constant 0 : i32
    return %arg0, %c0_i32 : i32, i32
  }
  func.func @transform_1(%arg0: i32) -> (i32, i32) {
    %c0_i32 = arith.constant 0 : i32
    %c0_i32_0 = arith.constant 0 : i32
    %c0_i32_1 = arith.constant 0 : i32
    return %c0_i32, %c0_i32_0 : i32, i32
  }
  func.func @transform_2(%arg0: i32) -> (i32, i32) {
    %c0_i32 = arith.constant 0 : i32
    %c0_i32_0 = arith.constant 0 : i32
    return %arg0, %c0_i32 : i32, i32
  }
  func.func @transform_3(%arg0: i32) -> (i32, i32) {
    %c0_i32 = arith.constant 0 : i32
    %c0_i32_0 = arith.constant 0 : i32
    return %arg0, %c0_i32 : i32, i32
  }
  func.func @transform_4(%arg0: i32) -> (i32, i32) {
    %c0_i32 = arith.constant 0 : i32
    %c0_i32_0 = arith.constant 0 : i32
    return %arg0, %c0_i32 : i32, i32
  }
  func.func @transform_5(%arg0: i32) -> (i32, i32) {
    %c0_i32 = arith.constant 0 : i32
    %c0_i32_0 = arith.constant 0 : i32
    return %c0_i32, %arg0 : i32, i32
  }
}

</mosaic_0001>

<bundles_post_ra>
// kernel: tpu_custom_call.1
= control target key start
LH: loop header
LB: loop body
LE: loop exit
PB: predicated region body
PF: predicated region fallthrough
CT: control target
= control target key end

     0   :  { %10 = vsyncpa [#allocation3], 0  ;;  %s339_s0 = inlined_call_operand.vmem [shape: f32[8,128], index: 0, kind: input, shape index: {}]   ;;  %s340_s1 = inlined_call_operand.hbm [shape: f32[128,128], index: 1, kind: input, shape index: {}]   ;;  %s341_s2 = inlined_call_operand.vmem [shape: s32[8,1], index: 2, kind: input, shape index: {}]   ;;  %s342_s3 = inlined_call_operand.vmem [shape: f32[8,1], index: 3, kind: input, shape index: {}]   ;;  %s343_s4 = inlined_call_operand.vmem [shape: f32[8,1], index: 4, kind: input, shape index: {}]   ;;  %s344_s5 = inlined_call_operand.hbm [shape: f32[1,128], index: 5, kind: output, shape index: {}]  }
   0x1   :  { %11 = vsyncpa [#allocation4], 0  ;;  %s284_s18 = smov [#allocation2]  }
   0x2   :  { %s19_s19 = sshll.u32 %s284_s18, 4  ;;  %s20_s19 = int_to_ptr.vmem [resolvable:$true] %s19_s19 }
   0x3   :  { %s248_s20 = scalar_lea.vmem %s20_s19, 2048  ;;  %p253_p1 = scmp.lt.s32.totalorder %s20_s19, %s20_s19 }
   0x4   :  { %p249_p0 = scmp.ne.s32.totalorder %s20_s19, %s248_s20  ;;  %p254_p2 = scmp.lt.s32.totalorder %s248_s20, %s248_s20 }
   0x6   :  { %p255_p3 = por %p254_p2, %p253_p1 }
   0x8   :  { %p256_p4 = pnand %p255_p3, %p249_p0 }
   0xa   :  { %259 = shalt.err (!%p256_p4)
}
   0xb   :  { %s285_s21 = smov 128   ;;  %s286_s22 = smov 8  }
   0xc   :  { %25 = dma.hbm_to_vmem [thread:$0]  %s340_s1, 2048, %s20_s19, [#allocation3], %s285_s21, %s285_s21, %s286_s22  }
   0xd   :  { %280 = dma.done.wait [#allocation3], 2048  }
   0xe   :  { %281 = vsyncadd [#allocation3], 4294965248  ;;  %v287_v0 = vmov 0.0   ;;  %v35_v1 = vld [vmem:[%s339_s0] sm:$0xff]  ;;  %v59_v2 = vld [vmem:[#allocation2 + $0x78] sm:$0xff]  ;;  %vm288_vm0 = vmmov 0   ;;  %v130_v27 = vlaneseq }
   0xf   :  { %193 = vmatprep.subr.mxu0 %v287_v0  ;;  %v36_v3 = vmul.f32 %v35_v1, %v35_v1  ;;  %v58_v4 = vld [vmem:[#allocation2 + $0x70] sm:$0xff]  ;;  %v57_v5 = vld [vmem:[#allocation2 + $0x68] sm:$0xff]  ;;  %v56_v6 = vld [vmem:[#allocation2 + $0x60] sm:$0xff]  ;;  %225 = vmatprep.mubr.msk.f32.mxu0 %vm288_vm0, %v287_v0  ;;  %v289_v13 = vmov 0   ;;  %vm146_vm2 = vcmask 7168  }
  0x10   :  { %194 = vmatpush3.xpose.msra.mxu0 %v59_v2  ;;  %v55_v7 = vld [vmem:[#allocation2 + $0x58] sm:$0xff]  ;;  %v54_v8 = vld [vmem:[#allocation2 + $0x50] sm:$0xff]  ;;  %v53_v9 = vld [vmem:[#allocation2 + $0x48] sm:$0xff]  ;;  %237 = vset.pattern.permute.xlu0 %v289_v13  ;;  %v131_v28 = vand.u32 127, %v130_v27 }
  0x11   :  { %195 = vmatprep.subr.mxu0 %v287_v0  ;;  %37 = vadd.xlane.f32.xlu0 %v36_v3  ;;  %v52_v10 = vld [vmem:[#allocation2 + $0x40] sm:$0xff]  ;;  %v51_v11 = vld [vmem:[#allocation2 + $0x38] sm:$0xff]  ;;  %v50_v14 = vld [vmem:[#allocation2 + $0x30] sm:$0xff] }
  0x12   :  { %v132_v12 = vld [vmem:[%s341_s2] sm:$0xff]  ;;  %v49_v15 = vld [vmem:[#allocation2 + $0x28] sm:$0xff]  ;;  %v47_v17 = vld [vmem:[#allocation2 + $0x18] sm:$0xff]  ;;  %vm157_vm3 = vcmp.eq.s32.totalorder %v131_v28, 0 }
  0x13   :  { %v48_v16 = vld [vmem:[#allocation2 + $0x20] sm:$0xff]  ;;  %v46_v18 = vld [vmem:[#allocation2 + $0x10] sm:$0xff]  ;;  %v45_v19 = vld [vmem:[#allocation2 + $0x8] sm:$0xff] }
  0x14   :  { %196 = vmatpush3.xpose.msra.mxu0 %v58_v4  ;;  %v44_v20 = vld [vmem:[#allocation2] sm:$0xff] }
  0x15   :  { %197 = vmatprep.subr.mxu0 %v287_v0  ;;  %v140_v33 = vld [vmem:[%s343_s4] sm:$0xff]  ;;  %s290_s4 = smov [#allocation5]  }
  0x16   :  { %v144_v37 = vld [vmem:[%s342_s3] sm:$0xff]  ;;  %s167_s30 = sshll.u32 %s290_s4, 4  ;;  %s168_s30 = int_to_ptr.vmem [resolvable:$true] %s167_s30 }
  0x17   :  { %s260_s3 = scalar_lea.vmem %s168_s30, 16  ;;  %s264_s7 = scalar_lea.vmem %s168_s30, 32 }
  0x18   :  { %198 = vmatpush3.xpose.msra.mxu0 %v57_v5  ;;  %p261_p5 = scmp.ne.s32.totalorder %s168_s30, %s260_s3  ;;  %p265_p6 = scmp.lt.s32.totalorder %s168_s30, %s168_s30 }
  0x19   :  { %199 = vmatprep.subr.mxu0 %v287_v0  ;;  %p266_p7 = scmp.lt.s32.totalorder %s264_s7, %s260_s3 }
  0x1b   :  { %p267_p8 = por %p266_p7, %p265_p6 }
  0x1c   :  { %200 = vmatpush3.xpose.msra.mxu0 %v56_v6 }
  0x1d   :  { %201 = vmatprep.subr.mxu0 %v287_v0  ;;  %p268_p9 = pnand %p267_p8, %p261_p5 }
  0x20   :  { %202 = vmatpush3.xpose.msra.mxu0 %v55_v7 }
  0x21   :  { %203 = vmatprep.subr.mxu0 %v287_v0 }
  0x24   :  { %204 = vmatpush3.xpose.msra.mxu0 %v54_v8 }
  0x25   :  { %205 = vmatprep.subr.mxu0 %v287_v0 }
  0x27   :  { %134 = vperm.xlu0 %237, %v132_v12  }
  0x28   :  { %206 = vmatpush3.xpose.msra.mxu0 %v53_v9 }
  0x29   :  { %207 = vmatprep.subr.mxu0 %v287_v0 }
  0x2c   :  { %208 = vmatpush3.xpose.msra.mxu0 %v52_v10 }
  0x2d   :  { %209 = vmatprep.subr.mxu0 %v287_v0 }
  0x30   :  { %210 = vmatpush3.xpose.msra.mxu0 %v51_v11 }
  0x31   :  { %211 = vmatprep.subr.mxu0 %v287_v0 }
  0x34   :  { %212 = vmatpush3.xpose.msra.mxu0 %v50_v14 }
  0x35   :  { %213 = vmatprep.subr.mxu0 %v287_v0 }
  0x38   :  { %214 = vmatpush3.xpose.msra.mxu0 %v49_v15 }
  0x39   :  { %215 = vmatprep.subr.mxu0 %v287_v0 }
  0x3c   :  { %216 = vmatpush3.xpose.msra.mxu0 %v48_v16 }
  0x3d   :  { %217 = vmatprep.subr.mxu0 %v287_v0 }
  0x40   :  { %218 = vmatpush3.xpose.msra.mxu0 %v47_v17 }
  0x41   :  { %219 = vmatprep.subr.mxu0 %v287_v0 }
  0x44   :  { %220 = vmatpush3.xpose.msra.mxu0 %v46_v18 }
  0x45   :  { %221 = vmatprep.subr.mxu0 %v287_v0 }
  0x48   :  { %222 = vmatpush3.xpose.msra.mxu0 %v45_v19 }
  0x49   :  { %223 = vmatprep.subr.mxu0 %v287_v0 }
  0x4c   :  { %224 = vmatpush3.xpose.msra.mxu0 %v44_v20 }
  0x9a   :  { %v38_v21 = vpop.xlane.xlu0 %37 }
  0x9b   :  { %v39_v22 = vmax.f32 %v38_v21, 1e-24 }
  0x9d   :  { %238 = vrsqrt.f32 %v39_v22 }
  0xa2   :  { %v135_v29 = vpop.permute.xlu0 %134 }
  0xa3   :  { %vm136_vm1 = vcmp.eq.s32.totalorder %v131_v28, %v135_v29 }
  0xaa   :  { %v239_v23 = vpop.eup %238 }
  0xab   :  { %v42_v24 = vmul.f32 %v239_v23, %v38_v21  ;;  %v41_v25 = vmul.f32 %v239_v23, %v35_v1 }
  0xad   :  { %v43_v26 = vmul.f32 %v239_v23, %v42_v24  ;;  %226 = vmatmul.mubr.f32.vlgmr.msra.gmra.mxu0 %v41_v25 }
  0xaf   :  { %v141_v35 = vadd.f32 %v140_v33, %v43_v26 }
 0x16d   :  { %v126_v30 = vpop.f32.mrf.mxu0 }
 0x16e   :  { %v137_v31 = vsel %vm136_vm1, %v126_v30, 0.0 }
 0x16f   :  { %v227_v32 = vpop.f32.mrf.mxu0  ;;  %138 = vadd.xlane.f32.xlu1 %v137_v31 }
 0x1f8   :  { %v139_v34 = vpop.xlane.xlu1 %138 }
 0x1f9   :  { %v142_v36 = vmul.f32 2.0, %v139_v34 }
 0x1fb   :  { %v143_v38 = vsub.f32 %v141_v35, %v142_v36 }
 0x1fd   :  { %v145_v39 = vmul.f32 %v144_v37, %v143_v38 }
 0x1ff   :  { %v147_v40 = vsel %vm146_vm2, %v145_v39, 0.0 }
 0x200   :  { %148 = vadd.xlane.f32.xlu1 %v147_v40 }
 0x289   :  { %v149_v41 = vpop.xlane.xlu1 %148 }
 0x28a   :  { %v150_v42 = vrot.slane %v149_v41, 4 }
 0x28c   :  { %v151_v43 = vadd.f32 %v150_v42, %v149_v41 }
 0x28e   :  { %v152_v44 = vrot.slane %v151_v43, 2 }
 0x290   :  { %v153_v45 = vadd.f32 %v152_v44, %v151_v43 }
 0x292   :  { %v154_v46 = vrot.slane %v153_v45, 1 }
 0x294   :  { %v155_v47 = vadd.f32 %v154_v46, %v153_v45 }
 0x296   :  { %228 = vpush %v155_v47 }
 0x2c7   :  { %s229_s6 = spop %228 }
 0x2c8   :  { %v158_v48 = vstv %s229_s6 }
 0x2c9   :  { %v159_v49 = vsel %vm157_vm3, %v158_v48, 0.0 }
 0x2ca   :  { %160 = vst [vmem:[#allocation5] sm:$0x1] %v159_v49 }
 0x2cb   :  { %271 = shalt.err (!%p268_p9)
}
 0x2cc   :  { %170 = dma.vmem_to_hbm [thread:$0]  %s168_s30, 16, %s344_s5, [#allocation4]  }
 0x2cd   :  { %282 = dma.done.wait [#allocation4], 16  }
 0x2ce   :  { %283 = vsyncadd [#allocation4], 4294967280 }
 0x2cf   :  { %174 = vsyncpa [#allocation3], 1 }
 0x2d0   :  { %175 = vsyncpa [#allocation4], 1 }

// kernel: tpu_custom_call.1
= control target key start
LH: loop header
LB: loop body
LE: loop exit
PB: predicated region body
PF: predicated region fallthrough
CT: control target
= control target key end

     0   :  { %10 = vsyncpa [#allocation3], 0  ;;  %s339_s0 = inlined_call_operand.vmem [shape: f32[8,128], index: 0, kind: input, shape index: {}]   ;;  %s340_s1 = inlined_call_operand.hbm [shape: f32[128,128], index: 1, kind: input, shape index: {}]   ;;  %s341_s2 = inlined_call_operand.vmem [shape: s32[8,1], index: 2, kind: input, shape index: {}]   ;;  %s342_s3 = inlined_call_operand.vmem [shape: f32[8,1], index: 3, kind: input, shape index: {}]   ;;  %s343_s4 = inlined_call_operand.vmem [shape: f32[8,1], index: 4, kind: input, shape index: {}]   ;;  %s344_s5 = inlined_call_operand.hbm [shape: f32[1,128], index: 5, kind: output, shape index: {}]  }
   0x1   :  { %11 = vsyncpa [#allocation4], 0  ;;  %s284_s18 = smov [#allocation2]  }
   0x2   :  { %s19_s19 = sshll.u32 %s284_s18, 4  ;;  %s20_s19 = int_to_ptr.vmem [resolvable:$true] %s19_s19 }
   0x3   :  { %s248_s20 = scalar_lea.vmem %s20_s19, 2048  ;;  %p253_p1 = scmp.lt.s32.totalorder %s20_s19, %s20_s19 }
   0x4   :  { %p249_p0 = scmp.ne.s32.totalorder %s20_s19, %s248_s20  ;;  %p254_p2 = scmp.lt.s32.totalorder %s248_s20, %s248_s20 }
   0x6   :  { %p255_p3 = por %p254_p2, %p253_p1 }
   0x8   :  { %p256_p4 = pnand %p255_p3, %p249_p0 }
   0xa   :  { %259 = shalt.err (!%p256_p4)
}
   0xb   :  { %s285_s21 = smov 128   ;;  %s286_s22 = smov 8  }
   0xc   :  { %25 = dma.hbm_to_vmem [thread:$0]  %s340_s1, 2048, %s20_s19, [#allocation3], %s285_s21, %s285_s21, %s286_s22  }
   0xd   :  { %280 = dma.done.wait [#allocation3], 2048  }
   0xe   :  { %281 = vsyncadd [#allocation3], 4294965248  ;;  %v287_v0 = vmov 0.0   ;;  %v35_v1 = vld [vmem:[%s339_s0] sm:$0xff]  ;;  %v59_v2 = vld [vmem:[#allocation2 + $0x78] sm:$0xff]  ;;  %vm288_vm0 = vmmov 0   ;;  %v130_v27 = vlaneseq }
   0xf   :  { %193 = vmatprep.subr.mxu0 %v287_v0  ;;  %v36_v3 = vmul.f32 %v35_v1, %v35_v1  ;;  %v58_v4 = vld [vmem:[#allocation2 + $0x70] sm:$0xff]  ;;  %v57_v5 = vld [vmem:[#allocation2 + $0x68] sm:$0xff]  ;;  %v56_v6 = vld [vmem:[#allocation2 + $0x60] sm:$0xff]  ;;  %225 = vmatprep.mubr.msk.f32.mxu0 %vm288_vm0, %v287_v0  ;;  %v289_v13 = vmov 0   ;;  %vm146_vm2 = vcmask 7168  }
  0x10   :  { %194 = vmatpush3.xpose.msra.mxu0 %v59_v2  ;;  %v55_v7 = vld [vmem:[#allocation2 + $0x58] sm:$0xff]  ;;  %v54_v8 = vld [vmem:[#allocation2 + $0x50] sm:$0xff]  ;;  %v53_v9 = vld [vmem:[#allocation2 + $0x48] sm:$0xff]  ;;  %237 = vset.pattern.permute.xlu0 %v289_v13  ;;  %v131_v28 = vand.u32 127, %v130_v27 }
  0x11   :  { %195 = vmatprep.subr.mxu0 %v287_v0  ;;  %37 = vadd.xlane.f32.xlu0 %v36_v3  ;;  %v52_v10 = vld [vmem:[#allocation2 + $0x40] sm:$0xff]  ;;  %v51_v11 = vld [vmem:[#allocation2 + $0x38] sm:$0xff]  ;;  %v50_v14 = vld [vmem:[#allocation2 + $0x30] sm:$0xff] }
  0x12   :  { %v132_v12 = vld [vmem:[%s341_s2] sm:$0xff]  ;;  %v49_v15 = vld [vmem:[#allocation2 + $0x28] sm:$0xff]  ;;  %v47_v17 = vld [vmem:[#allocation2 + $0x18] sm:$0xff]  ;;  %vm157_vm3 = vcmp.eq.s32.totalorder %v131_v28, 0 }
  0x13   :  { %v48_v16 = vld [vmem:[#allocation2 + $0x20] sm:$0xff]  ;;  %v46_v18 = vld [vmem:[#allocation2 + $0x10] sm:$0xff]  ;;  %v45_v19 = vld [vmem:[#allocation2 + $0x8] sm:$0xff] }
  0x14   :  { %196 = vmatpush3.xpose.msra.mxu0 %v58_v4  ;;  %v44_v20 = vld [vmem:[#allocation2] sm:$0xff] }
  0x15   :  { %197 = vmatprep.subr.mxu0 %v287_v0  ;;  %v140_v33 = vld [vmem:[%s343_s4] sm:$0xff]  ;;  %s290_s4 = smov [#allocation5]  }
  0x16   :  { %v144_v37 = vld [vmem:[%s342_s3] sm:$0xff]  ;;  %s167_s30 = sshll.u32 %s290_s4, 4  ;;  %s168_s30 = int_to_ptr.vmem [resolvable:$true] %s167_s30 }
  0x17   :  { %s260_s3 = scalar_lea.vmem %s168_s30, 16  ;;  %s264_s7 = scalar_lea.vmem %s168_s30, 32 }
  0x18   :  { %198 = vmatpush3.xpose.msra.mxu0 %v57_v5  ;;  %p261_p5 = scmp.ne.s32.totalorder %s168_s30, %s260_s3  ;;  %p265_p6 = scmp.lt.s32.totalorder %s168_s30, %s168_s30 }
  0x19   :  { %199 = vmatprep.subr.mxu0 %v287_v0  ;;  %p266_p7 = scmp.lt.s32.totalorder %s264_s7, %s260_s3 }
  0x1b   :  { %p267_p8 = por %p266_p7, %p265_p6 }
  0x1c   :  { %200 = vmatpush3.xpose.msra.mxu0 %v56_v6 }
  0x1d   :  { %201 = vmatprep.subr.mxu0 %v287_v0  ;;  %p268_p9 = pnand %p267_p8, %p261_p5 }
  0x20   :  { %202 = vmatpush3.xpose.msra.mxu0 %v55_v7 }
  0x21   :  { %203 = vmatprep.subr.mxu0 %v287_v0 }
  0x24   :  { %204 = vmatpush3.xpose.msra.mxu0 %v54_v8 }
  0x25   :  { %205 = vmatprep.subr.mxu0 %v287_v0 }
  0x27   :  { %134 = vperm.xlu0 %237, %v132_v12  }
  0x28   :  { %206 = vmatpush3.xpose.msra.mxu0 %v53_v9 }
  0x29   :  { %207 = vmatprep.subr.mxu0 %v287_v0 }
  0x2c   :  { %208 = vmatpush3.xpose.msra.mxu0 %v52_v10 }
  0x2d   :  { %209 = vmatprep.subr.mxu0 %v287_v0 }
  0x30   :  { %210 = vmatpush3.xpose.msra.mxu0 %v51_v11 }
  0x31   :  { %211 = vmatprep.subr.mxu0 %v287_v0 }
  0x34   :  { %212 = vmatpush3.xpose.msra.mxu0 %v50_v14 }
  0x35   :  { %213 = vmatprep.subr.mxu0 %v287_v0 }
  0x38   :  { %214 = vmatpush3.xpose.msra.mxu0 %v49_v15 }
  0x39   :  { %215 = vmatprep.subr.mxu0 %v287_v0 }
  0x3c   :  { %216 = vmatpush3.xpose.msra.mxu0 %v48_v16 }
  0x3d   :  { %217 = vmatprep.subr.mxu0 %v287_v0 }
  0x40   :  { %218 = vmatpush3.xpose.msra.mxu0 %v47_v17 }
  0x41   :  { %219 = vmatprep.subr.mxu0 %v287_v0 }
  0x44   :  { %220 = vmatpush3.xpose.msra.mxu0 %v46_v18 }
  0x45   :  { %221 = vmatprep.subr.mxu0 %v287_v0 }
  0x48   :  { %222 = vmatpush3.xpose.msra.mxu0 %v45_v19 }
  0x49   :  { %223 = vmatprep.subr.mxu0 %v287_v0 }
  0x4c   :  { %224 = vmatpush3.xpose.msra.mxu0 %v44_v20 }
  0x9a   :  { %v38_v21 = vpop.xlane.xlu0 %37 }
  0x9b   :  { %v39_v22 = vmax.f32 %v38_v21, 1e-24 }
  0x9d   :  { %238 = vrsqrt.f32 %v39_v22 }
  0xa2   :  { %v135_v29 = vpop.permute.xlu0 %134 }
  0xa3   :  { %vm136_vm1 = vcmp.eq.s32.totalorder %v131_v28, %v135_v29 }
  0xaa   :  { %v239_v23 = vpop.eup %238 }
  0xab   :  { %v42_v24 = vmul.f32 %v239_v23, %v38_v21  ;;  %v41_v25 = vmul.f32 %v239_v23, %v35_v1 }
  0xad   :  { %v43_v26 = vmul.f32 %v239_v23, %v42_v24  ;;  %226 = vmatmul.mubr.f32.vlgmr.msra.gmra.mxu0 %v41_v25 }
  0xaf   :  { %v141_v35 = vadd.f32 %v140_v33, %v43_v26 }
 0x16d   :  { %v126_v30 = vpop.f32.mrf.mxu0 }
 0x16e   :  { %v137_v31 = vsel %vm136_vm1, %v126_v30, 0.0 }
 0x16f   :  { %v227_v32 = vpop.f32.mrf.mxu0  ;;  %138 = vadd.xlane.f32.xlu1 %v137_v31 }
 0x1f8   :  { %v139_v34 = vpop.xlane.xlu1 %138 }
 0x1f9   :  { %v142_v36 = vmul.f32 2.0, %v139_v34 }
 0x1fb   :  { %v143_v38 = vsub.f32 %v141_v35, %v142_v36 }
 0x1fd   :  { %v145_v39 = vmul.f32 %v144_v37, %v143_v38 }
 0x1ff   :  { %v147_v40 = vsel %vm146_vm2, %v145_v39, 0.0 }
 0x200   :  { %148 = vadd.xlane.f32.xlu1 %v147_v40 }
 0x289   :  { %v149_v41 = vpop.xlane.xlu1 %148 }
 0x28a   :  { %v150_v42 = vrot.slane %v149_v41, 4 }
 0x28c   :  { %v151_v43 = vadd.f32 %v150_v42, %v149_v41 }
 0x28e   :  { %v152_v44 = vrot.slane %v151_v43, 2 }
 0x290   :  { %v153_v45 = vadd.f32 %v152_v44, %v151_v43 }
 0x292   :  { %v154_v46 = vrot.slane %v153_v45, 1 }
 0x294   :  { %v155_v47 = vadd.f32 %v154_v46, %v153_v45 }
 0x296   :  { %228 = vpush %v155_v47 }
 0x2c7   :  { %s229_s6 = spop %228 }
 0x2c8   :  { %v158_v48 = vstv %s229_s6 }
 0x2c9   :  { %v159_v49 = vsel %vm157_vm3, %v158_v48, 0.0 }
 0x2ca   :  { %160 = vst [vmem:[#allocation5] sm:$0x1] %v159_v49 }
 0x2cb   :  { %271 = shalt.err (!%p268_p9)
}
 0x2cc   :  { %170 = dma.vmem_to_hbm [thread:$0]  %s168_s30, 16, %s344_s5, [#allocation4]  }
 0x2cd   :  { %282 = dma.done.wait [#allocation4], 16  }
 0x2ce   :  { %283 = vsyncadd [#allocation4], 4294967280 }
 0x2cf   :  { %174 = vsyncpa [#allocation3], 1 }
 0x2d0   :  { %175 = vsyncpa [#allocation4], 1 }

</bundles_post_ra>
